<compile_context>
chip_gen: v6e
topology: v6e:2x2x1
jax: 0.10.0
libtpu: 0.0.40
codegen_flags: <defaults>
</compile_context>

<pallas_src>
import functools

import jax
import jax.numpy as jnp
from jax.experimental import pallas as pl
from jax.experimental.pallas import tpu as pltpu


def _layernorm_kernel(x_ref, w_ref, b_ref, o_ref, *, eps, h_actual):
    # Torch-exact math: stats in float32, variance = E[x^2] (NOT centered),
    # normalized value cast back to input dtype before the f32 affine.
    x_in = x_ref[...]                                   # (rows_blk, Hp), input dtype
    x = x_in.astype(jnp.float32)
    inv_h = jnp.float32(1.0 / h_actual)                 # padded lanes are zeros -> sums unaffected
    mean = jnp.sum(x, axis=-1, keepdims=True) * inv_h
    var = jnp.sum(x * x, axis=-1, keepdims=True) * inv_h
    x_norm = ((x - mean) * jax.lax.rsqrt(var + eps)).astype(x_in.dtype)
    o_ref[...] = (w_ref[...] * x_norm + b_ref[...]).astype(o_ref.dtype)


def layernorm_pallas(x, weight, bias, eps=1e-6, out_dtype=None,
                     target_tile_bytes=2 * 1024 * 1024):
    """x: (..., H). weight, bias: (H,). Returns same shape.

    out_dtype=None follows the torch module's promotion (f32 params * input dtype),
    i.e. float32 output. Pass out_dtype=x.dtype for bf16 inputs to halve writeback.
    """
    orig_shape = x.shape
    H = orig_shape[-1]
    x2d = x.reshape(-1, H)
    N = x2d.shape[0]

    if out_dtype is None:
        out_dtype = jnp.promote_types(x.dtype, jnp.float32)

    # ---- lane-dense layout: pad hidden to a multiple of 128 -----------------
    Hp = ((H + 127) // 128) * 128
    w = weight.astype(jnp.float32)
    b = bias.astype(jnp.float32)
    if Hp != H:
        x2d = jnp.pad(x2d, ((0, 0), (0, Hp - H)))
        w = jnp.pad(w, (0, Hp - H))
        b = jnp.pad(b, (0, Hp - H))
    w2d = w.reshape(1, Hp)
    b2d = b.reshape(1, Hp)

    in_itemsize = jnp.dtype(x.dtype).itemsize
    out_itemsize = jnp.dtype(out_dtype).itemsize

    # ---- pick block_rows so the per-step input tile is ~target_tile_bytes ---
    row_mult = 8
    if min(in_itemsize, out_itemsize) < 4:
        row_mult = 32 // min(in_itemsize, out_itemsize)   # 16 for bf16, 32 for 8-bit
    rows_target = max(row_mult, (target_tile_bytes // (Hp * in_itemsize)) // row_mult * row_mult)
    rows_needed = ((N + row_mult - 1) // row_mult) * row_mult
    block_rows = int(max(row_mult, min(rows_target, rows_needed)))

    # ---- ragged tail: pad rows to a multiple of block_rows ------------------
    Np = ((N + block_rows - 1) // block_rows) * block_rows
    if Np != N:
        x2d = jnp.pad(x2d, ((0, Np - N), (0, 0)))

    # ---- VMEM budget: double-buffered in+out tiles + tiny w/b tiles ---------
    tile_in = block_rows * Hp * in_itemsize
    tile_out = block_rows * Hp * out_itemsize
    needed = 2 * (tile_in + tile_out) + 4 * Hp * 4
    vmem_limit = int(min(max(2 * needed, 16 * 1024 * 1024), 48 * 1024 * 1024))

    kernel = functools.partial(_layernorm_kernel, eps=float(eps), h_actual=H)

    out = pl.pallas_call(
        kernel,
        out_shape=jax.ShapeDtypeStruct((Np, Hp), out_dtype),
        grid_spec=pltpu.PrefetchScalarGridSpec(
            num_scalar_prefetch=0,
            grid=(Np // block_rows,),
            in_specs=[
                pl.BlockSpec((block_rows, Hp), lambda i: (i, 0)),
                pl.BlockSpec((1, Hp), lambda i: (0, 0)),
                pl.BlockSpec((1, Hp), lambda i: (0, 0)),
            ],
            out_specs=pl.BlockSpec((block_rows, Hp), lambda i: (i, 0)),
        ),
        compiler_params=pltpu.CompilerParams(
            dimension_semantics=("parallel",),
            vmem_limit_bytes=vmem_limit,
        ),
    )(x2d, w2d, b2d)

    out = out[:N, :H]
    return out.reshape(orig_shape[:-1] + (H,))


def layernorm_ref(x, weight, bias, eps=1e-6):
    x32 = x.astype(jnp.float32)
    mean = jnp.mean(x32, axis=-1, keepdims=True)
    var = jnp.mean(x32 * x32, axis=-1, keepdims=True)
    xn = ((x32 - mean) * jax.lax.rsqrt(var + eps)).astype(x.dtype)
    return weight.astype(jnp.float32) * xn + bias.astype(jnp.float32)


if __name__ == "__main__":
    key = jax.random.PRNGKey(0)
    k1, k2, k3, k4 = jax.random.split(key, 4)

    # Small shapes consistent with the module's forward: (batch, seq, hidden).
    batch, seq, hidden = 2, 8, 32
    x = jax.random.normal(k1, (batch, seq, hidden), dtype=jnp.float32)

    # Parameters as in __init__ (ones / zeros), perturbed so the affine is exercised.
    weight = jnp.ones((hidden,), jnp.float32) + 0.1 * jax.random.normal(k2, (hidden,))
    bias = jnp.zeros((hidden,), jnp.float32) + 0.1 * jax.random.normal(k3, (hidden,))

    out = layernorm_pallas(x, weight, bias, eps=1e-6)
    out = jax.block_until_ready(out)
    ref = layernorm_ref(x, weight, bias, eps=1e-6)
    assert out.shape == x.shape and out.dtype == jnp.float32
    assert jnp.allclose(out, ref, atol=1e-5, rtol=1e-5)

    # Second case: row count not a multiple of the tile (exercises ragged padding).
    x2 = jax.random.normal(k4, (3, 5, hidden), dtype=jnp.float32)
    out2 = jax.block_until_ready(layernorm_pallas(x2, weight, bias, eps=1e-6))
    ref2 = layernorm_ref(x2, weight, bias, eps=1e-6)
    assert out2.shape == x2.shape
    assert jnp.allclose(out2, ref2, atol=1e-5, rtol=1e-5)

    print("KERNEL_OK")
</pallas_src>

<mosaic_0001>
module attributes {stable_mosaic.version = 11 : i64} {
  func.func @_layernorm_kernel(%arg0: i32, %arg1: memref<16x128xf32, #tpu.memory_space<vmem>>, %arg2: memref<1x128xf32, #tpu.memory_space<vmem>>, %arg3: memref<1x128xf32, #tpu.memory_space<vmem>>, %arg4: memref<16x128xf32, #tpu.memory_space<vmem>>) attributes {dimension_semantics = [#tpu.dimension_semantics<parallel>], iteration_bounds = array<i64: 1>, scalar_prefetch = 0 : i64, scratch_operands = 0 : i64, tpu.core_type = #tpu.core_type<tc>, window_params = [{transform_indices = @transform_0, window_bounds = array<i64: 16, 128>}, {pipeline_mode = #tpu.pipeline_mode<synchronous>, transform_indices = @transform_1, window_bounds = array<i64: 1, 128>}, {pipeline_mode = #tpu.pipeline_mode<synchronous>, transform_indices = @transform_2, window_bounds = array<i64: 1, 128>}, {transform_indices = @transform_3, window_bounds = array<i64: 16, 128>}]} {
    %c0 = arith.constant 0 : index
    %c0_0 = arith.constant 0 : index
    %0 = vector.load %arg1[%c0, %c0_0] : memref<16x128xf32, #tpu.memory_space<vmem>>, vector<16x128xf32>
    %cst = arith.constant dense<0.000000e+00> : vector<16xf32>
    %1 = vector.multi_reduction <add>, %0, %cst [1] : vector<16x128xf32> to vector<16xf32>
    %2 = vector.shape_cast %1 : vector<16xf32> to vector<16x1xf32>
    %cst_1 = arith.constant 3.125000e-02 : f32
    %3 = vector.broadcast %cst_1 : f32 to vector<16x1xf32>
    %4 = arith.mulf %2, %3 : vector<16x1xf32>
    %5 = arith.mulf %0, %0 : vector<16x128xf32>
    %cst_2 = arith.constant dense<0.000000e+00> : vector<16xf32>
    %6 = vector.multi_reduction <add>, %5, %cst_2 [1] : vector<16x128xf32> to vector<16xf32>
    %7 = vector.shape_cast %6 : vector<16xf32> to vector<16x1xf32>
    %cst_3 = arith.constant 3.125000e-02 : f32
    %8 = vector.broadcast %cst_3 : f32 to vector<16x1xf32>
    %9 = arith.mulf %7, %8 : vector<16x1xf32>
    %10 = vector.broadcast %4 : vector<16x1xf32> to vector<16x128xf32>
    %11 = arith.subf %0, %10 : vector<16x128xf32>
    %cst_4 = arith.constant 9.99999997E-7 : f32
    %12 = vector.broadcast %cst_4 : f32 to vector<16x1xf32>
    %13 = arith.addf %9, %12 : vector<16x1xf32>
    %14 = math.rsqrt %13 : vector<16x1xf32>
    %15 = vector.broadcast %14 : vector<16x1xf32> to vector<16x128xf32>
    %16 = arith.mulf %11, %15 : vector<16x128xf32>
    %c0_5 = arith.constant 0 : index
    %c0_6 = arith.constant 0 : index
    %17 = vector.load %arg2[%c0_5, %c0_6] : memref<1x128xf32, #tpu.memory_space<vmem>>, vector<1x128xf32>
    %18 = vector.broadcast %17 : vector<1x128xf32> to vector<16x128xf32>
    %19 = arith.mulf %18, %16 : vector<16x128xf32>
    %c0_7 = arith.constant 0 : index
    %c0_8 = arith.constant 0 : index
    %20 = vector.load %arg3[%c0_7, %c0_8] : memref<1x128xf32, #tpu.memory_space<vmem>>, vector<1x128xf32>
    %21 = vector.broadcast %20 : vector<1x128xf32> to vector<16x128xf32>
    %22 = arith.addf %19, %21 : vector<16x128xf32>
    %c0_9 = arith.constant 0 : index
    %c0_10 = arith.constant 0 : index
    %23 = vector.load %arg4[%c0_9, %c0_10] : memref<16x128xf32, #tpu.memory_space<vmem>>, vector<16x128xf32>
    tpu.vector_store %arg4[%c0_9, %c0_10], %22 {strides = array<i32>} : memref<16x128xf32, #tpu.memory_space<vmem>>, vector<16x128xf32>,
    return
  }
  func.func @transform_0(%arg0: i32) -> (i32, i32) {
    %c0_i32 = arith.constant 0 : i32
    %c0_i32_0 = arith.constant 0 : i32
    return %arg0, %c0_i32 : i32, i32
  }
  func.func @transform_1(%arg0: i32) -> (i32, i32) {
    %c0_i32 = arith.constant 0 : i32
    %c0_i32_0 = arith.constant 0 : i32
    %c0_i32_1 = arith.constant 0 : i32
    return %c0_i32, %c0_i32_0 : i32, i32
  }
  func.func @transform_2(%arg0: i32) -> (i32, i32) {
    %c0_i32 = arith.constant 0 : i32
    %c0_i32_0 = arith.constant 0 : i32
    %c0_i32_1 = arith.constant 0 : i32
    return %c0_i32, %c0_i32_0 : i32, i32
  }
  func.func @transform_3(%arg0: i32) -> (i32, i32) {
    %c0_i32 = arith.constant 0 : i32
    %c0_i32_0 = arith.constant 0 : i32
    return %arg0, %c0_i32 : i32, i32
  }
}

</mosaic_0001>

<bundles_post_ra>
// kernel: tpu_custom_call.1
= control target key start
LH: loop header
LB: loop body
LE: loop exit
PB: predicated region body
PF: predicated region fallthrough
CT: control target
= control target key end

     0   :  { %8 = vsyncpa [#allocation3], 0  ;;  %s186_s0 = inlined_call_operand.hbm [shape: f32[16,128], index: 0, kind: input, shape index: {}]   ;;  %s187_s1 = inlined_call_operand.vmem [shape: f32[1,128], index: 1, kind: input, shape index: {}]   ;;  %s188_s2 = inlined_call_operand.vmem [shape: f32[1,128], index: 2, kind: input, shape index: {}]   ;;  %s189_s3 = inlined_call_operand.hbm [shape: f32[16,128], index: 3, kind: output, shape index: {}]  }
   0x1   :  { %9 = vsyncpa [#allocation4], 0  ;;  %s144_s12 = smov [#allocation2]  }
   0x2   :  { %s15_s13 = sshll.u32 %s144_s12, 4  ;;  %s16_s13 = int_to_ptr.vmem [resolvable:$true] %s15_s13 }
   0x3   :  { %s108_s14 = scalar_lea.vmem %s16_s13, 256  ;;  %p113_p1 = scmp.lt.s32.totalorder %s16_s13, %s16_s13 }
   0x4   :  { %p109_p0 = scmp.ne.s32.totalorder %s16_s13, %s108_s14  ;;  %p114_p2 = scmp.lt.s32.totalorder %s108_s14, %s108_s14 }
   0x6   :  { %p115_p3 = por %p114_p2, %p113_p1 }
   0x8   :  { %p116_p4 = pnand %p115_p3, %p109_p0 }
   0xa   :  { %119 = shalt.err (!%p116_p4)
}
   0xb   :  { %s145_s15 = smov 128   ;;  %s146_s16 = smov 8  }
   0xc   :  { %21 = dma.hbm_to_vmem [thread:$0]  %s186_s0, 256, %s16_s13, [#allocation3], %s145_s15, %s145_s15, %s146_s16  }
   0xd   :  { %140 = dma.done.wait [#allocation3], 256  }
   0xe   :  { %141 = vsyncadd [#allocation3], 4294967040  ;;  %v29_v0 = vld [vmem:[#allocation2] sm:$0xff]  ;;  %v30_v1 = vld [vmem:[#allocation2 + $0x8] sm:$0xff]  ;;  %s147_s22 = smov [#allocation5]  }
   0xf   :  { %v37_v2 = vmul.f32 %v29_v0, %v29_v0  ;;  %31 = vadd.xlane.f32.xlu1 %v29_v0  ;;  %v38_v3 = vmul.f32 %v30_v1, %v30_v1  ;;  %v90_v16 = vld [vmem:[%s187_s1] ss:$0 sm:$0xff]  ;;  %s78_s23 = sshll.u32 %s147_s22, 4  ;;  %s79_s23 = int_to_ptr.vmem [resolvable:$true] %s78_s23 }
  0x10   :  { %v91_v19 = vld [vmem:[%s188_s2] ss:$0 sm:$0xff]  ;;  %s120_s24 = scalar_lea.vmem %s79_s23, 256  ;;  %p125_p6 = scmp.lt.s32.totalorder %s79_s23, %s79_s23 }
  0x11   :  { %39 = vadd.xlane.f32.xlu0 %v37_v2  ;;  %p121_p5 = scmp.ne.s32.totalorder %s79_s23, %s120_s24  ;;  %p126_p7 = scmp.lt.s32.totalorder %s120_s24, %s120_s24 }
  0x13   :  { %33 = vadd.xlane.f32.xlu1 %v30_v1  ;;  %p127_p8 = por %p126_p7, %p125_p6 }
  0x15   :  { %41 = vadd.xlane.f32.xlu0 %v38_v3  ;;  %p128_p9 = pnand %p127_p8, %p121_p5 }
  0x98   :  { %v32_v9 = vpop.xlane.xlu1 %31 }
  0x99   :  { %v35_v11 = vmul.f32 0.03125, %v32_v9 }
  0x9a   :  { %v40_v4 = vpop.xlane.xlu0 %39 }
  0x9b   :  { %v43_v5 = vmul.f32 0.03125, %v40_v4  ;;  %v45_v13 = vsub.f32 %v29_v0, %v35_v11 }
  0x9c   :  { %v34_v12 = vpop.xlane.xlu1 %33 }
  0x9d   :  { %v47_v6 = vadd.f32 1e-06, %v43_v5  ;;  %v36_v14 = vmul.f32 0.03125, %v34_v12 }
  0x9e   :  { %v42_v7 = vpop.xlane.xlu0 %41 }
  0x9f   :  { %96 = vrsqrt.f32 %v47_v6  ;;  %v44_v8 = vmul.f32 0.03125, %v42_v7  ;;  %v46_v18 = vsub.f32 %v30_v1, %v36_v14 }
  0xa1   :  { %v48_v10 = vadd.f32 1e-06, %v44_v8 }
  0xa3   :  { %98 = vrsqrt.f32 %v48_v10 }
  0xac   :  { %v97_v15 = vpop.eup %96 }
  0xad   :  { %v51_v17 = vmul.f32 %v97_v15, %v45_v13 }
  0xaf   :  { %v60_v20 = vmul.f32 %v90_v16, %v51_v17 }
  0xb0   :  { %v99_v21 = vpop.eup %98 }
  0xb1   :  { %v52_v22 = vmul.f32 %v99_v21, %v46_v18  ;;  %v69_v23 = vadd.f32 %v91_v19, %v60_v20 }
  0xb3   :  { %v61_v24 = vmul.f32 %v90_v16, %v52_v22  ;;  %71 = vst [vmem:[#allocation5] sm:$0xff] %v69_v23 }
  0xb5   :  { %v70_v25 = vadd.f32 %v91_v19, %v61_v24 }
  0xb7   :  { %72 = vst [vmem:[#allocation5 + $0x8] sm:$0xff] %v70_v25 }
  0xb8   :  { %131 = shalt.err (!%p128_p9)
}
  0xb9   :  { %84 = dma.vmem_to_hbm [thread:$0]  %s79_s23, 256, %s189_s3, [#allocation4], %s145_s15, %s145_s15, %s146_s16  }
  0xba   :  { %142 = dma.done.wait [#allocation4], 256  }
  0xbb   :  { %143 = vsyncadd [#allocation4], 4294967040 }
  0xbc   :  { %88 = vsyncpa [#allocation3], 1 }
  0xbd   :  { %89 = vsyncpa [#allocation4], 1 }

</bundles_post_ra>
